<compile_context>
chip_gen: v5e
topology: v5e:2x2
jax: 0.10.0
libtpu: 0.0.40
codegen_flags: <defaults>
</compile_context>

<pallas_src>
import functools

import jax
import jax.numpy as jnp
import numpy as np
from jax import lax
from jax.experimental import pallas as pl
from jax.experimental.pallas import tpu as pltpu

SMOOTH = 1.0
LANES = 128
MAX_ROWS_PER_BLOCK = 8192            # 8192 * 128 * 4 B = 4 MiB per input buffer
VMEM_LIMIT_BYTES = 32 * 1024 * 1024  # 2 inputs x 2 pipeline bufs x 4 MiB + headroom
NEG_BIG = -1e9                       # sigmoid(NEG_BIG) == 0.0 exactly in f32


def _largest_divisor_le(n, limit, multiple_of=1):
    """Largest d with d | n, d <= limit and d % multiple_of == 0 (or None)."""
    if n <= 0 or limit <= 0:
        return None
    best = None
    i = 1
    while i * i <= n:
        if n % i == 0:
            for d in (i, n // i):
                if d <= limit and d % multiple_of == 0 and (best is None or d > best):
                    best = d
        i += 1
    return best


def _dice_partial_kernel(x_ref, t_ref, out_ref, *, tr, rp_valid, need_row_mask):
    # x_ref / t_ref: (TB, 1, TR, 128) VMEM tile of the channel-1 plane.
    # out_ref:       (1, 3, 128) lane-dense per-block partial sums
    #                rows = [sum(s*t), sum(s), sum(t)] reduced over all but lanes.
    x = x_ref[...].astype(jnp.float32)
    t = t_ref[...].astype(jnp.float32)

    # sigmoid(x) == 0.5 * tanh(0.5*x) + 0.5 : one EUP push per element
    # (exp + reciprocal form would be two); the mul/add ride the VALU slots.
    s = 0.5 * jnp.tanh(0.5 * x) + 0.5

    if need_row_mask:
        r = pl.program_id(1)
        last = pl.num_programs(1) - 1

        def _mask(s_in, t_in):
            rid = lax.broadcasted_iota(jnp.int32, s_in.shape, 2) + r * tr
            valid = rid < rp_valid
            return jnp.where(valid, s_in, 0.0), jnp.where(valid, t_in, 0.0)

        # Only the final row-block pays the iota/compare/select VPU cost.
        s, t = lax.cond(r == last, _mask, lambda a, b: (a, b), s, t)

    st = s * t
    # Reduce over batch (axis 0) and rows (axis 2), keep the 128 lanes:
    # cross-vreg VPU adds + one sublane reduce; the store is full-lane.
    out_ref[0, 0:1, :] = jnp.sum(st, axis=(0, 2))
    out_ref[0, 1:2, :] = jnp.sum(s, axis=(0, 2))
    out_ref[0, 2:3, :] = jnp.sum(t, axis=(0, 2))


def dice_loss(inputs: jax.Array, targets: jax.Array, smooth: float = SMOOTH) -> jax.Array:
    """Pallas implementation of DiceLoss.forward(inputs, targets, smooth=1)."""
    assert inputs.shape == targets.shape
    N, C, H, W = inputs.shape
    assert C >= 2, "forward indexes channel 1"
    HW = H * W

    if HW % LANES == 0:
        # Free, contiguous reshape to a lane-dense layout; kernel picks channel 1.
        Rp = HW // LANES
        x4 = inputs.reshape(N, C, Rp, LANES)
        t4 = targets.reshape(N, C, Rp, LANES)
        ch = 1
    else:
        # Fallback: slice channel 1, pad the flattened plane to a lane multiple.
        # Logits are padded with a large negative constant (sigmoid -> exactly 0
        # in f32) and targets with 0, so the padding contributes nothing to any
        # of the three sums and no validity mask is needed.
        # TODO(synk): avoid the materialized padded copy for non-128-multiple planes.
        pad = (-HW) % LANES
        Rp = (HW + pad) // LANES
        x4 = jnp.pad(inputs[:, 1].reshape(N, HW), ((0, 0), (0, pad)),
                     constant_values=NEG_BIG).reshape(N, 1, Rp, LANES)
        t4 = jnp.pad(targets[:, 1].reshape(N, HW), ((0, 0), (0, pad)),
                     constant_values=0).reshape(N, 1, Rp, LANES)
        ch = 0

    # ----- Block sizing (prefer exact divisors -> no masks at all) ----------
    if Rp <= MAX_ROWS_PER_BLOCK:
        TR = Rp                                            # whole plane rows per step
        max_tb = max(1, MAX_ROWS_PER_BLOCK // max(Rp, 1))
        TB = _largest_divisor_le(N, min(N, max_tb)) or 1   # divides N -> no batch mask
    else:
        TB = 1
        # Multiple-of-8 divisor of Rp -> valid sublane tiling and no row tail mask.
        d = _largest_divisor_le(Rp, MAX_ROWS_PER_BLOCK, multiple_of=8)
        TR = d if (d is not None and d >= 1024) else MAX_ROWS_PER_BLOCK

    NB = pl.cdiv(N, TB)
    RB = pl.cdiv(Rp, TR)

    # v7x shards "parallel" grid axes across its 2 TensorCores: make sure the
    # grid has >= 2 steps whenever the data allows (also enables DMA/compute
    # overlap instead of a single monolithic step).
    if NB * RB == 1:
        if N >= 2:
            TB = _largest_divisor_le(N, N // 2) or 1
        elif Rp >= 16:
            d = _largest_divisor_le(Rp, Rp // 2, multiple_of=8)
            if d is not None:
                TR = d
        NB = pl.cdiv(N, TB)
        RB = pl.cdiv(Rp, TR)

    need_row_mask = (Rp % TR) != 0   # only the rare "no good divisor" case

    kernel = functools.partial(_dice_partial_kernel, tr=TR, rp_valid=Rp,
                               need_row_mask=need_row_mask)

    in_spec = pl.BlockSpec((TB, 1, TR, LANES), lambda b, r: (b, ch, r, 0))
    out_spec = pl.BlockSpec((1, 3, LANES), lambda b, r: (b * RB + r, 0, 0))

    partials = pl.pallas_call(
        kernel,
        out_shape=jax.ShapeDtypeStruct((NB * RB, 3, LANES), jnp.float32),
        grid_spec=pltpu.PrefetchScalarGridSpec(
            num_scalar_prefetch=0,
            grid=(NB, RB),
            in_specs=[in_spec, in_spec],
            out_specs=out_spec,
        ),
        compiler_params=pltpu.CompilerParams(
            dimension_semantics=("parallel", "parallel"),
            vmem_limit_bytes=VMEM_LIMIT_BYTES),
    )(x4, t4)

    # Tiny final combine over per-block, per-lane partials.
    sums = jnp.sum(partials, axis=(0, 2))
    inter, s_sum, t_sum = sums[0], sums[1], sums[2]
    dice = (2.0 * inter + smooth) / (s_sum + t_sum + smooth)
    return 1.0 - dice


def _dice_loss_ref(inputs, targets, smooth=SMOOTH):
    s = jax.nn.sigmoid(inputs)[:, 1, :, :].reshape(-1)
    t = targets[:, 1, :, :].reshape(-1)
    inter = jnp.sum(s * t)
    dice = (2.0 * inter + smooth) / (jnp.sum(s) + jnp.sum(t) + smooth)
    return 1.0 - dice


if __name__ == "__main__":
    key = jax.random.PRNGKey(0)
    k1, k2 = jax.random.split(key)

    N, C, H, W = 2, 4, 16, 16
    inputs = jax.random.normal(k1, (N, C, H, W), dtype=jnp.float32)
    targets = (jax.random.uniform(k2, (N, C, H, W)) > 0.5).astype(jnp.float32)

    loss = jax.block_until_ready(dice_loss(inputs, targets))
    ref = jax.block_until_ready(_dice_loss_ref(inputs, targets))
    np.testing.assert_allclose(np.asarray(loss), np.asarray(ref), rtol=1e-5, atol=1e-5)

    print("KERNEL_OK")
</pallas_src>

<mosaic_0001>
module attributes {stable_mosaic.version = 11 : i64} {
  func.func @_dice_partial_kernel(%arg0: i32, %arg1: i32, %arg2: memref<1x1x2x128xf32, #tpu.memory_space<vmem>>, %arg3: memref<1x1x2x128xf32, #tpu.memory_space<vmem>>, %arg4: memref<1x3x128xf32, #tpu.memory_space<vmem>>) attributes {dimension_semantics = [#tpu.dimension_semantics<parallel>, #tpu.dimension_semantics<parallel>], iteration_bounds = array<i64: 2, 1>, scalar_prefetch = 0 : i64, scratch_operands = 0 : i64, tpu.core_type = #tpu.core_type<tc>, window_params = [{transform_indices = @transform_0, window_bounds = array<i64: 1, 1, 2, 128>}, {transform_indices = @transform_1, window_bounds = array<i64: 1, 1, 2, 128>}, {transform_indices = @transform_2, window_bounds = array<i64: 1, 3, 128>}]} {
    %c0 = arith.constant 0 : index
    %c0_0 = arith.constant 0 : index
    %c0_1 = arith.constant 0 : index
    %c0_2 = arith.constant 0 : index
    %0 = vector.load %arg2[%c0, %c0_0, %c0_1, %c0_2] : memref<1x1x2x128xf32, #tpu.memory_space<vmem>>, vector<1x1x2x128xf32>
    %c0_3 = arith.constant 0 : index
    %c0_4 = arith.constant 0 : index
    %c0_5 = arith.constant 0 : index
    %c0_6 = arith.constant 0 : index
    %1 = vector.load %arg3[%c0_3, %c0_4, %c0_5, %c0_6] : memref<1x1x2x128xf32, #tpu.memory_space<vmem>>, vector<1x1x2x128xf32>
    %cst = arith.constant 5.000000e-01 : f32
    %2 = vector.broadcast %cst : f32 to vector<1x1x2x128xf32>
    %3 = arith.mulf %2, %0 : vector<1x1x2x128xf32>
    %4 = math.tanh %3 : vector<1x1x2x128xf32>
    %cst_7 = arith.constant 5.000000e-01 : f32
    %5 = vector.broadcast %cst_7 : f32 to vector<1x1x2x128xf32>
    %6 = arith.mulf %5, %4 : vector<1x1x2x128xf32>
    %cst_8 = arith.constant 5.000000e-01 : f32
    %7 = vector.broadcast %cst_8 : f32 to vector<1x1x2x128xf32>
    %8 = arith.addf %6, %7 : vector<1x1x2x128xf32>
    %9 = arith.mulf %8, %1 : vector<1x1x2x128xf32>
    %cst_9 = arith.constant dense<0.000000e+00> : vector<1x128xf32>
    %10 = vector.multi_reduction <add>, %9, %cst_9 [0, 2] : vector<1x1x2x128xf32> to vector<1x128xf32>
    %c0_10 = arith.constant 0 : index
    %c0_11 = arith.constant 0 : index
    %c0_12 = arith.constant 0 : index
    %11 = vector.load %arg4[%c0_10, %c0_11, %c0_12] : memref<1x3x128xf32, #tpu.memory_space<vmem>>, vector<1x1x128xf32>
    %12 = vector.shape_cast %11 : vector<1x1x128xf32> to vector<1x128xf32>
    %13 = vector.shape_cast %10 : vector<1x128xf32> to vector<1x1x128xf32>
    tpu.vector_store %arg4[%c0_10, %c0_11, %c0_12], %13 {strides = array<i32>} : memref<1x3x128xf32, #tpu.memory_space<vmem>>, vector<1x1x128xf32>,
    %cst_13 = arith.constant dense<0.000000e+00> : vector<1x128xf32>
    %14 = vector.multi_reduction <add>, %8, %cst_13 [0, 2] : vector<1x1x2x128xf32> to vector<1x128xf32>
    %c0_14 = arith.constant 0 : index
    %c1 = arith.constant 1 : index
    %c0_15 = arith.constant 0 : index
    %15 = vector.load %arg4[%c0_14, %c1, %c0_15] : memref<1x3x128xf32, #tpu.memory_space<vmem>>, vector<1x1x128xf32>
    %16 = vector.shape_cast %15 : vector<1x1x128xf32> to vector<1x128xf32>
    %17 = vector.shape_cast %14 : vector<1x128xf32> to vector<1x1x128xf32>
    tpu.vector_store %arg4[%c0_14, %c1, %c0_15], %17 {strides = array<i32>} : memref<1x3x128xf32, #tpu.memory_space<vmem>>, vector<1x1x128xf32>,
    %cst_16 = arith.constant dense<0.000000e+00> : vector<1x128xf32>
    %18 = vector.multi_reduction <add>, %1, %cst_16 [0, 2] : vector<1x1x2x128xf32> to vector<1x128xf32>
    %c0_17 = arith.constant 0 : index
    %c2 = arith.constant 2 : index
    %c0_18 = arith.constant 0 : index
    %19 = vector.load %arg4[%c0_17, %c2, %c0_18] : memref<1x3x128xf32, #tpu.memory_space<vmem>>, vector<1x1x128xf32>
    %20 = vector.shape_cast %19 : vector<1x1x128xf32> to vector<1x128xf32>
    %21 = vector.shape_cast %18 : vector<1x128xf32> to vector<1x1x128xf32>
    tpu.vector_store %arg4[%c0_17, %c2, %c0_18], %21 {strides = array<i32>} : memref<1x3x128xf32, #tpu.memory_space<vmem>>, vector<1x1x128xf32>,
    return
  }
  func.func @transform_0(%arg0: i32, %arg1: i32) -> (i32, i32, i32, i32) {
    %c1_i32 = arith.constant 1 : i32
    %c0_i32 = arith.constant 0 : i32
    %c0_i32_0 = arith.constant 0 : i32
    return %arg0, %c1_i32, %arg1, %c0_i32 : i32, i32, i32, i32
  }
  func.func @transform_1(%arg0: i32, %arg1: i32) -> (i32, i32, i32, i32) {
    %c1_i32 = arith.constant 1 : i32
    %c0_i32 = arith.constant 0 : i32
    %c0_i32_0 = arith.constant 0 : i32
    return %arg0, %c1_i32, %arg1, %c0_i32 : i32, i32, i32, i32
  }
  func.func @transform_2(%arg0: i32, %arg1: i32) -> (i32, i32, i32) {
    %c1_i32 = arith.constant 1 : i32
    %0 = arith.muli %arg0, %c1_i32 : i32
    %1 = arith.addi %0, %arg1 : i32
    %c0_i32 = arith.constant 0 : i32
    %c0_i32_0 = arith.constant 0 : i32
    %c0_i32_1 = arith.constant 0 : i32
    return %1, %c0_i32, %c0_i32_0 : i32, i32, i32
  }
}

</mosaic_0001>

<bundles_post_ra>
// kernel: tpu_custom_call.1
= control target key start
LH: loop header
LB: loop body
LE: loop exit
PB: predicated region body
PF: predicated region fallthrough
CT: control target
= control target key end

     0   :  { %7 = vsyncpa [#allocation3], 0  ;;  %s681_s0 = inlined_call_operand.hbm [shape: f32[2,4,2,128], index: 0, kind: input, shape index: {}]   ;;  %s682_s1 = inlined_call_operand.hbm [shape: f32[2,4,2,128], index: 1, kind: input, shape index: {}]   ;;  %s683_s2 = inlined_call_operand.vmem [shape: f32[2,3,128], index: 2, kind: output, shape index: {}]  }
   0x1   :  { %9 = vsyncpa [#allocation3 + $0x1], 0 }
   0x2   :  { %10 = vsyncpa [#allocation5], 0 }
   0x3   :  { %12 = vsyncpa [#allocation5 + $0x1], 0  ;;  %s575_s9 = smov 0   ;;  %s577_s10 = smov 0  }
   0x4   :  { %s579_s11 = smov 0   ;;  %s581_s12 = smov 0  }
   0x5   :  { %s583_s13 = smov 0   ;;  %s585_s14 = smov 0  }
   0x6 LB: > { %s364_s15 = sadd.s32 4294967295, %s558_s14   ;;  %s30_s16 = sadd.s32 1, %s554_s13  ;;  %s558_s14 = sphi %s585_s14, %s18_s14   ;;  %s554_s13 = sphi %s583_s13, %s691_s13   ;;  %s550_s12 = sphi %s581_s12, %s690_s12   ;;  %s546_s11 = sphi %s579_s11, %s689_s11   ;;  %s542_s10 = sphi %s577_s10, %s688_s10   ;;  %s538_s9 = sphi %s575_s9, %s687_s9  }
   0x7   : > { %p32_p0 = scmp.ge.s32.totalorder %s30_s16, 2  ;;  %s39_s17 = sadd.s32 1, %s546_s11 }
   0x8   : > { %p46_p1 = scmp.ne.s32.totalorder %s546_s11, %s542_s10  ;;  %p47_p2 = scmp.eq.s32.totalorder %s558_s14, 0 }
   0x9   : > { %s693_s16 = smov (%p32_p0, %s30_s16), 0  ;;  %p52_p4 = scmp.ne.s32.totalorder %s542_s10, %s538_s9 }
   0xa   : > { %p611_p3 = por %p47_p2, %p46_p1  ;;  %s34_s19 = ssub.s32 %s554_s13, %s693_s16 }
   0xb   : > { %p53_p5 = scmp.eq.s32.totalorder %s364_s15, 0  ;;  %p37_p6 = scmp.eq.s32.totalorder %s34_s19, 0 }
   0xc   : > { %p393_p8 = scmp.lt.s32.totalorder %s558_s14, 2  ;;  %s132_s22 = sand.u32 1, %s546_s11  }
   0xd   : > { %p618_p7 = por %p53_p5, %p52_p4  ;;  %s380_s23 = sshll.u32 %s554_s13, 3 }
   0xe   : > { %s624_s21 = scalar_select %p37_p6, %s546_s11, %s39_s17  }
   0xf   : > { %s368_s24 = sshll.u32 %s132_s22, 1  ;;  %s293_s27 = scalar_lea.hbm %s681_s0, %s380_s23 }
  0x10   : > { %s294_s28 = scalar_lea.hbm %s293_s27, 2  ;;  %s136_s29 = scalar_lea.vmem [#allocation2], %s368_s24 }
  0x11   : > { %s147_s30 = sshll.u32 %s136_s29, 4  ;;  %s145_s3 = sshll.u32 %s294_s28, 4  ;;  %s148_s30 = int_to_ptr.vmem [resolvable:$true] %s147_s30  ;;  %s146_s3 = int_to_ptr.hbm [resolvable:$true] %s145_s3 }
  0x12   : > { %p633_p9 = pnand %p393_p8, %p611_p3  ;;  %p374_p10 = scmp.ge.s32.totalorder %s558_s14, 1 }
  0x13   : > { %p174_p11 = scmp.lt.s32.totalorder %s558_s14, 3  ;;  %s133_s5 = scalar_lea.sflag [#allocation3], %s132_s22 }
  0x14   : > { %389 = dma.hbm_to_vmem [thread:$0]  (!%p633_p9), %s146_s3, 32, %s148_s30, %s133_s5  }
  0x15   : > { %p175_p12 = pnand %p374_p10, %p174_p11  ;;  %s301_s8 = scalar_lea.hbm %s682_s1, %s380_s23 }
  0x16   : > { %s158_s9 = scalar_lea.vmem [#allocation4], %s368_s24  ;;  %s302_s17 = scalar_lea.hbm %s301_s8, 2 }
  0x17   : > { %s169_s15 = sshll.u32 %s158_s9, 4  ;;  %s167_s18 = sshll.u32 %s302_s17, 4  ;;  %s170_s15 = int_to_ptr.vmem [resolvable:$true] %s169_s15  ;;  %s168_s18 = int_to_ptr.hbm [resolvable:$true] %s167_s18 }
  0x18   : > { %s155_s19 = scalar_lea.sflag [#allocation5], %s132_s22  ;;  %178 = sbr.rel (%p175_p12) target bundleno = 62 (0x3e), region = 28 }
  0x19   : > { %392 = dma.hbm_to_vmem [thread:$0]  (!%p633_p9), %s168_s18, 32, %s170_s15, %s155_s19  }
  0x1a   : > { %s180_s25 = sand.u32 (!%p175_p12), 1, %s542_s10  }
  0x1b   : > { %s375_s26 = sshll.u32 (!%p175_p12), %s180_s25, 1  ;;  %s181_s27 = scalar_lea.sflag (!%p175_p12), [#allocation3], %s180_s25 }
  0x1c   : > { %s184_s28 = scalar_lea.vmem (!%p175_p12), [#allocation2], %s375_s26 }
  0x1d   : > { %529 = dma.done.wait (%p618_p7), %s181_s27, 32  }
  0x1e   : > { %531 = vsyncadd (%p618_p7), %s181_s27, 4294967264  ;;  %s191_s23 = scalar_lea.sflag [#allocation5], %s180_s25  ;;  %s194_s24 = scalar_lea.vmem [#allocation4], %s375_s26 }
  0x1f   : > { %533 = dma.done.wait (%p618_p7), %s191_s23, 32  }
  0x20   : > { %535 = vsyncadd (%p618_p7), %s191_s23, 4294967264  ;;  %vm234_vm0 = vcmask 1041408   ;;  %p222_p13 = scmp.lt.s32.totalorder %s550_s12, 1  ;;  %v227_v0 = vld [vmem:[%s184_s28] sm:$0x3] }
  0x21   : > { %v228_v1 = vld [vmem:[%s194_s24] sm:$0x3]  ;;  %v229_v2 = vmul.f32 0.5, %v227_v0 }
  0x22   : > { %v251_v3 = vsel %vm234_vm0, %v228_v1, 0.0  ;;  %s695_s12 = smov (!%p222_p13, %s550_s12), 1 }
  0x23   : > { %v252_v4 = vrot.slane %v251_v3, 4  ;;  %442 = vtanh.f32 %v229_v2  ;;  %s377_s22 = sshll.u32 %s695_s12, 2 }
  0x24   : > { %s225_s30 = scalar_lea.vmem %s683_s2, %s377_s22 }
  0x25   : > { %v253_v5 = vadd.f32 %v252_v4, %v251_v3 }
  0x27   : > { %v254_v6 = vrot.slane %v253_v5, 2 }
  0x29   : > { %v255_v7 = vadd.f32 %v254_v6, %v253_v5  ;;  %v443_v8 = vpop.eup %442 }
  0x2a   : > { %v231_v9 = vmul.f32 0.5, %v443_v8 }
  0x2b   : > { %v256_v10 = vrot.slane %v255_v7, 1 }
  0x2c   : > { %v232_v11 = vadd.f32 0.5, %v231_v9 }
  0x2d   : > { %v257_v12 = vadd.f32 %v256_v10, %v255_v7 }
  0x2e   : > { %v233_v13 = vmul.f32 %v232_v11, %v228_v1  ;;  %v243_v14 = vsel %vm234_vm0, %v232_v11, 0.0 }
  0x2f   : > { %258 = vst [vmem:[%s225_s30 + $0x2] sm:$0x1] %v257_v12  ;;  %v244_v15 = vrot.slane %v243_v14, 4 }
  0x30   : > { %v235_v16 = vsel %vm234_vm0, %v233_v13, 0.0 }
  0x31   : > { %v236_v17 = vrot.slane %v235_v16, 4  ;;  %v245_v18 = vadd.f32 %v244_v15, %v243_v14 }
  0x33   : > { %v237_v19 = vadd.f32 %v236_v17, %v235_v16  ;;  %v246_v20 = vrot.slane %v245_v18, 2 }
  0x35   : > { %v238_v21 = vrot.slane %v237_v19, 2  ;;  %v247_v22 = vadd.f32 %v246_v20, %v245_v18 }
  0x37   : > { %v239_v23 = vadd.f32 %v238_v21, %v237_v19  ;;  %v248_v24 = vrot.slane %v247_v22, 1 }
  0x39   : > { %v240_v25 = vrot.slane %v239_v23, 1  ;;  %v249_v26 = vadd.f32 %v248_v24, %v247_v22 }
  0x3b   : > { %v241_v27 = vadd.f32 %v240_v25, %v239_v23  ;;  %250 = vst [vmem:[%s225_s30 + $0x1] sm:$0x1] %v249_v26 }
  0x3d   : > { %242 = vst [vmem:[%s225_s30] sm:$0x1] %v241_v27 }
  0x3e PF: > { %s18_s14 = sadd.s32 1, %s558_s14   ;;  %s687_s9 = smov %s542_s10 }
  0x3f   : > { %p15_p0 = scmp.ge.s32.totalorder %s18_s14, 4   ;;  %s688_s10 = smov %s546_s11 }
  0x40   : > { %s689_s11 = smov %s624_s21  ;;  %s690_s12 = smov %s554_s13 }
  0x41   : > { %s691_s13 = smov %s693_s16  ;;  %17 = sbr.rel (!%p15_p0) target bundleno = 6 (0x6), region = 81 }
  0x46   :  { %281 = vsyncpa [#allocation3], 1 }
  0x47   :  { %283 = vsyncpa [#allocation3 + $0x1], 1 }
  0x48   :  { %284 = vsyncpa [#allocation5], 1 }
  0x49   :  { %286 = vsyncpa [#allocation5 + $0x1], 1 }

</bundles_post_ra>
